<compile_context>
chip_gen: v6e
topology: v6e:2x2x1
jax: 0.10.0
libtpu: 0.0.40
codegen_flags: <defaults>
</compile_context>

<pallas_src>
import jax
import jax.numpy as jnp
from jax.experimental import pallas as pl
from jax.experimental.pallas import tpu as pltpu

EPS = 1e-5  # torch.nn.LayerNorm default

# Flipped to False automatically if this jax build rejects pl.Buffered(1).
_SINGLE_BUFFER = True


# --------------------------------------------------------------------------- #
# Small helpers: rounding, hardware query, tile sizing, VMEM budget.
# --------------------------------------------------------------------------- #
def _round_up(x, m):
    return ((x + m - 1) // m) * m


def _sublane_multiple(dtype):
    # Packed-sublane multiple: 8 for 4-byte, 16 for 2-byte, 32 for 1-byte.
    return {4: 8, 2: 16, 1: 32}.get(jnp.dtype(dtype).itemsize, 8)


def _vmem_capacity_bytes():
    try:
        return int(pltpu.get_tpu_info().vmem_capacity_bytes)
    except Exception:
        return 64 * 1024 * 1024  # conservative (v7x per-TensorCore size)


def _pick_tiles(M, D, Dout, x_dtype, w_dtype, out_dtype, vmem_cap, tm=None, tn=None):
    """Pick (tm, tn) so x/out double-buffers + LN scratch + weight fit VMEM."""
    xb = jnp.dtype(x_dtype).itemsize
    wb = jnp.dtype(w_dtype).itemsize
    ob = jnp.dtype(out_dtype).itemsize
    sub = _sublane_multiple(x_dtype)

    # Dout tiling: keep W fully resident if it fits ~35% of VMEM, else tile
    # Dout in lane-dense multiples of 256 (double-buffered weight tiles).
    if tn is None:
        w_budget = int(0.35 * vmem_cap)
        if D * Dout * wb <= w_budget:
            tn = Dout
        else:
            tn = ((w_budget // (2 * D * wb)) // 256) * 256
            tn = int(min(max(tn, 256), Dout))
    w_resident = (1 if tn == Dout else 2) * D * tn * wb

    # Row tile: fill what's left of ~80% of VMEM, capped at 512 rows (per-step
    # pipeline overhead ~0.35us is already well amortized there).
    if tm is None:
        avail = int(0.80 * vmem_cap) - w_resident
        per_row = 2 * D * xb + D * 4 + 2 * tn * ob   # x(2x) + LN scratch(f32) + out(2x)
        tm = int(min(512, max(avail, 0) // max(per_row, 1)))
    tm = min(tm, _round_up(M, sub))
    tm = max(sub, (tm // sub) * sub)
    return tm, tn


def _vmem_limit_bytes(tm, tn, D, n_j, x_dtype, w_dtype, out_dtype, vmem_cap,
                      single_buffer):
    xb = jnp.dtype(x_dtype).itemsize
    wb = jnp.dtype(w_dtype).itemsize
    ob = jnp.dtype(out_dtype).itemsize
    w_bufs = 1 if (n_j == 1 and single_buffer) else 2
    p_bufs = 1 if single_buffer else 2
    work = (2 * tm * D * xb            # x, double-buffered
            + tm * D * 4               # LN scratch (f32)
            + 2 * tm * tn * ob         # out, double-buffered
            + w_bufs * D * tn * wb     # weight
            + p_bufs * (2 * D + tn) * 4)   # gamma, beta, bias
    limit = max(int(work * 1.25) + (4 << 20), 8 << 20)   # headroom, >= 8 MiB
    return int(min(vmem_cap, limit))


def _call_with_fallback(build, *args):
    """Run build(single_buffer=True)(*args); fall back to default buffering."""
    global _SINGLE_BUFFER
    if _SINGLE_BUFFER:
        try:
            return build(True)(*args)
        except Exception:
            _SINGLE_BUFFER = False   # this build doesn't accept Buffered(1)
    return build(False)(*args)


# --------------------------------------------------------------------------- #
# Shared in-kernel LayerNorm math (f32 stats, two-pass variance, torch semantics).
# --------------------------------------------------------------------------- #
def _layernorm_rows(x, gamma, beta):
    xf = x.astype(jnp.float32)                                   # (tm, D)
    mean = jnp.mean(xf, axis=-1, keepdims=True)
    centered = xf - mean
    var = jnp.mean(centered * centered, axis=-1, keepdims=True)  # biased, like torch
    inv = jax.lax.rsqrt(var + EPS)
    return centered * inv * gamma.astype(jnp.float32) + beta.astype(jnp.float32)


# --------------------------------------------------------------------------- #
# Fused kernel: LayerNorm(x_tile) @ W_tile + bias_tile
# Grid: (row tiles of M, column tiles of Dout); LN cached in VMEM at j == 0.
# --------------------------------------------------------------------------- #
def _fused_prenorm_linear_kernel(x_ref, g_ref, b_ref, w_ref, bias_ref, o_ref, y_ref):
    @pl.when(pl.program_id(1) == 0)          # LN once per row tile
    def _():
        y_ref[...] = _layernorm_rows(x_ref[...], g_ref[...], b_ref[...])
    acc = jnp.dot(y_ref[...].astype(w_ref.dtype), w_ref[...],
                  preferred_element_type=jnp.float32)            # (tm, tn) f32
    o_ref[...] = (acc + bias_ref[...].astype(jnp.float32)).astype(o_ref.dtype)


def fused_prenorm_linear(x, gamma, beta, w, bias, *, tm=None, tn=None):
    """y = LayerNorm(x) @ w + bias, fused in a single pallas_call. x: (..., D)."""
    lead = x.shape[:-1]
    D = x.shape[-1]
    Dout = w.shape[1]
    x2d = x.reshape(-1, D)
    M = x2d.shape[0]

    vmem_cap = _vmem_capacity_bytes()
    tm, tn = _pick_tiles(M, D, Dout, x.dtype, w.dtype, x.dtype, vmem_cap, tm=tm, tn=tn)
    nm = pl.cdiv(M, tm)
    nn = pl.cdiv(Dout, tn)

    def build(single_buffer):
        def const_spec(shape, imap):
            if single_buffer:   # grid-invariant -> single buffer (half the VMEM)
                return pl.BlockSpec(shape, imap,
                                    pipeline_mode=pl.Buffered(buffer_count=1))
            return pl.BlockSpec(shape, imap)

        w_spec = (const_spec((D, tn), lambda i, j: (0, 0)) if nn == 1
                  else pl.BlockSpec((D, tn), lambda i, j: (0, j)))
        bias_spec = (const_spec((1, tn), lambda i, j: (0, 0)) if nn == 1
                     else pl.BlockSpec((1, tn), lambda i, j: (0, j)))

        return pl.pallas_call(
            _fused_prenorm_linear_kernel,
            out_shape=jax.ShapeDtypeStruct((M, Dout), x.dtype),
            grid_spec=pltpu.PrefetchScalarGridSpec(
                num_scalar_prefetch=0,
                grid=(nm, nn),
                in_specs=[
                    pl.BlockSpec((tm, D), lambda i, j: (i, 0)),   # activations
                    const_spec((1, D), lambda i, j: (0, 0)),      # gamma
                    const_spec((1, D), lambda i, j: (0, 0)),      # beta
                    w_spec,                                       # W  (D, tn)
                    bias_spec,                                    # bias (1, tn)
                ],
                out_specs=pl.BlockSpec((tm, tn), lambda i, j: (i, j)),
                scratch_shapes=[pltpu.VMEM((tm, D), jnp.float32)],  # LN cache
            ),
            compiler_params=pltpu.CompilerParams(
                dimension_semantics=("parallel", "arbitrary"),
                vmem_limit_bytes=_vmem_limit_bytes(
                    tm, tn, D, nn, x.dtype, w.dtype, x.dtype, vmem_cap,
                    single_buffer)),
        )

    out = _call_with_fallback(build, x2d, gamma.reshape(1, D), beta.reshape(1, D),
                              w, bias.reshape(1, Dout))
    return out.reshape(*lead, Dout)


# --------------------------------------------------------------------------- #
# Standalone LayerNorm kernel (for arbitrary wrapped fn).
# --------------------------------------------------------------------------- #
def _layernorm_kernel(x_ref, g_ref, b_ref, o_ref):
    o_ref[...] = _layernorm_rows(x_ref[...], g_ref[...], b_ref[...]).astype(o_ref.dtype)


def pallas_layernorm(x, gamma, beta, *, tm=None):
    """LayerNorm over the last dim of x: (..., D)."""
    lead = x.shape[:-1]
    D = x.shape[-1]
    x2d = x.reshape(-1, D)
    M = x2d.shape[0]

    vmem_cap = _vmem_capacity_bytes()
    xb = jnp.dtype(x.dtype).itemsize
    sub = _sublane_multiple(x.dtype)
    if tm is None:
        tm = min(512, int(0.8 * vmem_cap) // max(4 * D * xb, 1))   # x + out, 2x buffered
    tm = max(sub, (min(tm, _round_up(M, sub)) // sub) * sub)

    work = 4 * tm * D * xb + 4 * D * 4
    vmem_limit = int(min(vmem_cap, max(int(work * 1.25) + (4 << 20), 8 << 20)))

    def build(single_buffer):
        def const_spec(shape):
            if single_buffer:
                return pl.BlockSpec(shape, lambda i: (0, 0),
                                    pipeline_mode=pl.Buffered(buffer_count=1))
            return pl.BlockSpec(shape, lambda i: (0, 0))

        return pl.pallas_call(
            _layernorm_kernel,
            out_shape=jax.ShapeDtypeStruct((M, D), x.dtype),
            grid_spec=pltpu.PrefetchScalarGridSpec(
                num_scalar_prefetch=0,
                grid=(pl.cdiv(M, tm),),
                in_specs=[
                    pl.BlockSpec((tm, D), lambda i: (i, 0)),
                    const_spec((1, D)),
                    const_spec((1, D)),
                ],
                out_specs=pl.BlockSpec((tm, D), lambda i: (i, 0)),
            ),
            compiler_params=pltpu.CompilerParams(
                dimension_semantics=("parallel",),
                vmem_limit_bytes=vmem_limit),
        )

    out = _call_with_fallback(build, x2d, gamma.reshape(1, D), beta.reshape(1, D))
    return out.reshape(*lead, D)


# --------------------------------------------------------------------------- #
# Standalone Linear kernel (tiled over M and Dout, W resident when it fits).
# --------------------------------------------------------------------------- #
def _linear_kernel(x_ref, w_ref, b_ref, o_ref):
    acc = jnp.dot(x_ref[...].astype(w_ref.dtype), w_ref[...],
                  preferred_element_type=jnp.float32)
    o_ref[...] = (acc + b_ref[...].astype(jnp.float32)).astype(o_ref.dtype)


def pallas_linear(x2d, w, b, *, tm=None, tn=None):
    M, D = x2d.shape
    Dout = w.shape[1]
    vmem_cap = _vmem_capacity_bytes()
    tm, tn = _pick_tiles(M, D, Dout, x2d.dtype, w.dtype, x2d.dtype, vmem_cap,
                         tm=tm, tn=tn)
    nm = pl.cdiv(M, tm)
    nn = pl.cdiv(Dout, tn)

    def build(single_buffer):
        def const_spec(shape, imap):
            if single_buffer:
                return pl.BlockSpec(shape, imap,
                                    pipeline_mode=pl.Buffered(buffer_count=1))
            return pl.BlockSpec(shape, imap)

        w_spec = (const_spec((D, tn), lambda i, j: (0, 0)) if nn == 1
                  else pl.BlockSpec((D, tn), lambda i, j: (0, j)))
        b_spec = (const_spec((1, tn), lambda i, j: (0, 0)) if nn == 1
                  else pl.BlockSpec((1, tn), lambda i, j: (0, j)))

        return pl.pallas_call(
            _linear_kernel,
            out_shape=jax.ShapeDtypeStruct((M, Dout), x2d.dtype),
            grid_spec=pltpu.PrefetchScalarGridSpec(
                num_scalar_prefetch=0,
                grid=(nm, nn),
                in_specs=[pl.BlockSpec((tm, D), lambda i, j: (i, 0)), w_spec, b_spec],
                out_specs=pl.BlockSpec((tm, tn), lambda i, j: (i, j)),
            ),
            compiler_params=pltpu.CompilerParams(
                dimension_semantics=("parallel", "arbitrary"),
                vmem_limit_bytes=_vmem_limit_bytes(
                    tm, tn, D, nn, x2d.dtype, w.dtype, x2d.dtype, vmem_cap,
                    single_buffer)),
        )

    return _call_with_fallback(build, x2d, w, b.reshape(1, Dout))


# --------------------------------------------------------------------------- #
# PreNorm: y = fn(LayerNorm(x), **kwargs)
# --------------------------------------------------------------------------- #
class PallasLinear:
    """Linear(D -> Dout); when wrapped by PreNormPallas the LN is fused in."""

    def __init__(self, w, b):
        self.w = w   # (D, Dout); bf16 recommended on v6e/v7x for MXU throughput
        self.b = b   # (Dout,)

    def __call__(self, x):
        lead = x.shape[:-1]
        D = x.shape[-1]
        out = pallas_linear(x.reshape(-1, D), self.w, self.b)
        return out.reshape(*lead, self.w.shape[1])


class PreNormPallas:
    """torch PreNorm semantics: y = fn(LayerNorm(x), **kwargs)."""

    def __init__(self, dim, fn):
        self.dim = dim
        self.fn = fn
        # torch.nn.LayerNorm init: weight=1, bias=0
        self.gamma = jnp.ones((dim,), dtype=jnp.float32)
        self.beta = jnp.zeros((dim,), dtype=jnp.float32)

    def __call__(self, x, **kwargs):
        assert x.shape[-1] == self.dim
        # Fast path: fuse LayerNorm into the wrapped linear (no HBM round trip).
        if isinstance(self.fn, PallasLinear) and not kwargs:
            return fused_prenorm_linear(x, self.gamma, self.beta,
                                        self.fn.w, self.fn.b)
        # Generic path: standalone LN kernel, then whatever fn is.
        normed = pallas_layernorm(x, self.gamma, self.beta)
        return self.fn(normed, **kwargs)


if __name__ == "__main__":
    key = jax.random.PRNGKey(0)
    kx, kw, kb, kx2, kw2 = jax.random.split(key, 5)

    def ref_layernorm(x, g, bt):
        mean = jnp.mean(x, axis=-1, keepdims=True)
        var = jnp.mean((x - mean) ** 2, axis=-1, keepdims=True)
        return (x - mean) / jnp.sqrt(var + EPS) * g + bt

    # --- 1) Small PreNorm(Linear): fused LN+Linear path and unfused LN path.
    # NOTE: D=32 (<128) under-utilizes lanes/MXU; fine for a correctness-sized
    # example — real models should use D / Dout multiples of 128.
    B, N, D = 2, 8, 32
    x = jax.random.normal(kx, (B, N, D), dtype=jnp.float32)
    w = jax.random.normal(kw, (D, D), dtype=jnp.float32) * 0.02
    b = jax.random.normal(kb, (D,), dtype=jnp.float32) * 0.01

    model = PreNormPallas(D, PallasLinear(w, b))
    y = jax.block_until_ready(model(x))                            # fused path
    ln_only = jax.block_until_ready(pallas_layernorm(x, model.gamma, model.beta))

    ref_norm = ref_layernorm(x, model.gamma, model.beta)
    ref = ref_norm @ w + b
    assert jnp.allclose(ln_only, ref_norm, atol=1e-4, rtol=1e-4), "LN mismatch"
    assert jnp.allclose(y, ref, atol=1e-4, rtol=1e-4), "fused PreNorm mismatch"

    # --- 2) Non-tile-multiple M (padless partial last tile) + bf16 weights
    #        (bf16 MXU path, f32 accumulation) -> looser tolerance.
    B2, N2, D2, Dout2 = 2, 100, 128, 256                            # M=200, tm=128
    x2 = jax.random.normal(kx2, (B2, N2, D2), dtype=jnp.float32)
    w2 = (jax.random.normal(kw2, (D2, Dout2), dtype=jnp.float32) * 0.02
          ).astype(jnp.bfloat16)
    b2 = jnp.zeros((Dout2,), dtype=jnp.float32)
    gamma2 = jnp.ones((D2,), jnp.float32)
    beta2 = jnp.zeros((D2,), jnp.float32)

    y2 = jax.block_until_ready(
        fused_prenorm_linear(x2, gamma2, beta2, w2, b2, tm=128))
    ref2 = ref_layernorm(x2, gamma2, beta2) @ w2.astype(jnp.float32) + b2
    assert y2.shape == (B2, N2, Dout2)
    assert jnp.allclose(y2, ref2, atol=2e-2, rtol=2e-2), "bf16 fused mismatch"

    print("KERNEL_OK")
</pallas_src>

<mosaic_0001>
module attributes {stable_mosaic.version = 11 : i64} {
  func.func @_fused_prenorm_linear_kernel(%arg0: i32, %arg1: i32, %arg2: memref<16x32xf32, #tpu.memory_space<vmem>>, %arg3: memref<1x32xf32, #tpu.memory_space<vmem>>, %arg4: memref<1x32xf32, #tpu.memory_space<vmem>>, %arg5: memref<32x32xf32, #tpu.memory_space<vmem>>, %arg6: memref<1x32xf32, #tpu.memory_space<vmem>>, %arg7: memref<16x32xf32, #tpu.memory_space<vmem>>, %arg8: memref<16x32xf32, #tpu.memory_space<vmem>>) attributes {dimension_semantics = [#tpu.dimension_semantics<parallel>, #tpu.dimension_semantics<arbitrary>], iteration_bounds = array<i64: 1, 1>, scalar_prefetch = 0 : i64, scratch_operands = 1 : i64, tpu.core_type = #tpu.core_type<tc>, window_params = [{transform_indices = @transform_0, window_bounds = array<i64: 16, 32>}, {pipeline_mode = #tpu.pipeline_mode<synchronous>, transform_indices = @transform_1, window_bounds = array<i64: 1, 32>}, {pipeline_mode = #tpu.pipeline_mode<synchronous>, transform_indices = @transform_2, window_bounds = array<i64: 1, 32>}, {pipeline_mode = #tpu.pipeline_mode<synchronous>, transform_indices = @transform_3, window_bounds = array<i64: 32, 32>}, {pipeline_mode = #tpu.pipeline_mode<synchronous>, transform_indices = @transform_4, window_bounds = array<i64: 1, 32>}, {transform_indices = @transform_5, window_bounds = array<i64: 16, 32>}]} {
    %c0_i32 = arith.constant 0 : i32
    %0 = arith.cmpi eq, %arg1, %c0_i32 : i32
    %1 = arith.extui %0 : i1 to i32
    %c0_i32_0 = arith.constant 0 : i32
    %2 = arith.cmpi ne, %1, %c0_i32_0 : i32
    scf.if %2 {
      %c0_8 = arith.constant 0 : index
      %c0_9 = arith.constant 0 : index
      %10 = vector.load %arg2[%c0_8, %c0_9] : memref<16x32xf32, #tpu.memory_space<vmem>>, vector<16x32xf32>
      %c0_10 = arith.constant 0 : index
      %c0_11 = arith.constant 0 : index
      %11 = vector.load %arg3[%c0_10, %c0_11] : memref<1x32xf32, #tpu.memory_space<vmem>>, vector<1x32xf32>
      %c0_12 = arith.constant 0 : index
      %c0_13 = arith.constant 0 : index
      %12 = vector.load %arg4[%c0_12, %c0_13] : memref<1x32xf32, #tpu.memory_space<vmem>>, vector<1x32xf32>
      %cst_14 = arith.constant dense<0.000000e+00> : vector<16xf32>
      %13 = vector.multi_reduction <add>, %10, %cst_14 [1] : vector<16x32xf32> to vector<16xf32>
      %14 = vector.shape_cast %13 : vector<16xf32> to vector<16x1xf32>
      %cst_15 = arith.constant 3.200000e+01 : f32
      %15 = vector.broadcast %cst_15 : f32 to vector<16x1xf32>
      %16 = arith.divf %14, %15 : vector<16x1xf32>
      %17 = vector.broadcast %16 : vector<16x1xf32> to vector<16x32xf32>
      %18 = arith.subf %10, %17 : vector<16x32xf32>
      %19 = arith.mulf %18, %18 : vector<16x32xf32>
      %cst_16 = arith.constant dense<0.000000e+00> : vector<16xf32>
      %20 = vector.multi_reduction <add>, %19, %cst_16 [1] : vector<16x32xf32> to vector<16xf32>
      %21 = vector.shape_cast %20 : vector<16xf32> to vector<16x1xf32>
      %cst_17 = arith.constant 3.200000e+01 : f32
      %22 = vector.broadcast %cst_17 : f32 to vector<16x1xf32>
      %23 = arith.divf %21, %22 : vector<16x1xf32>
      %cst_18 = arith.constant 9.99999974E-6 : f32
      %24 = vector.broadcast %cst_18 : f32 to vector<16x1xf32>
      %25 = arith.addf %23, %24 : vector<16x1xf32>
      %26 = math.rsqrt %25 : vector<16x1xf32>
      %27 = vector.broadcast %26 : vector<16x1xf32> to vector<16x32xf32>
      %28 = arith.mulf %18, %27 : vector<16x32xf32>
      %29 = vector.broadcast %11 : vector<1x32xf32> to vector<16x32xf32>
      %30 = arith.mulf %28, %29 : vector<16x32xf32>
      %31 = vector.broadcast %12 : vector<1x32xf32> to vector<16x32xf32>
      %32 = arith.addf %30, %31 : vector<16x32xf32>
      %c0_19 = arith.constant 0 : index
      %c0_20 = arith.constant 0 : index
      %33 = vector.load %arg8[%c0_19, %c0_20] : memref<16x32xf32, #tpu.memory_space<vmem>>, vector<16x32xf32>
      tpu.vector_store %arg8[%c0_19, %c0_20], %32 {strides = array<i32>} : memref<16x32xf32, #tpu.memory_space<vmem>>, vector<16x32xf32>,
    } else {
    }
    %c0 = arith.constant 0 : index
    %c0_1 = arith.constant 0 : index
    %3 = vector.load %arg8[%c0, %c0_1] : memref<16x32xf32, #tpu.memory_space<vmem>>, vector<16x32xf32>
    %c0_2 = arith.constant 0 : index
    %c0_3 = arith.constant 0 : index
    %4 = vector.load %arg5[%c0_2, %c0_3] : memref<32x32xf32, #tpu.memory_space<vmem>>, vector<32x32xf32>
    %cst = arith.constant dense<0.000000e+00> : vector<16x32xf32>
    %5 = tpu.matmul %3, %4, %cst {dimension_numbers = #tpu.dot_dimension_numbers<[1], [0], [0], [1], [0, 0, 1, 1], [], []>} : vector<16x32xf32>, vector<32x32xf32>, vector<16x32xf32> -> vector<16x32xf32>
    %c0_4 = arith.constant 0 : index
    %c0_5 = arith.constant 0 : index
    %6 = vector.load %arg6[%c0_4, %c0_5] : memref<1x32xf32, #tpu.memory_space<vmem>>, vector<1x32xf32>
    %7 = vector.broadcast %6 : vector<1x32xf32> to vector<16x32xf32>
    %8 = arith.addf %5, %7 : vector<16x32xf32>
    %c0_6 = arith.constant 0 : index
    %c0_7 = arith.constant 0 : index
    %9 = vector.load %arg7[%c0_6, %c0_7] : memref<16x32xf32, #tpu.memory_space<vmem>>, vector<16x32xf32>
    tpu.vector_store %arg7[%c0_6, %c0_7], %8 {strides = array<i32>} : memref<16x32xf32, #tpu.memory_space<vmem>>, vector<16x32xf32>,
    return
  }
  func.func @transform_0(%arg0: i32, %arg1: i32) -> (i32, i32) {
    %c0_i32 = arith.constant 0 : i32
    %c0_i32_0 = arith.constant 0 : i32
    return %arg0, %c0_i32 : i32, i32
  }
  func.func @transform_1(%arg0: i32, %arg1: i32) -> (i32, i32) {
    %c0_i32 = arith.constant 0 : i32
    %c0_i32_0 = arith.constant 0 : i32
    %c0_i32_1 = arith.constant 0 : i32
    return %c0_i32, %c0_i32_0 : i32, i32
  }
  func.func @transform_2(%arg0: i32, %arg1: i32) -> (i32, i32) {
    %c0_i32 = arith.constant 0 : i32
    %c0_i32_0 = arith.constant 0 : i32
    %c0_i32_1 = arith.constant 0 : i32
    return %c0_i32, %c0_i32_0 : i32, i32
  }
  func.func @transform_3(%arg0: i32, %arg1: i32) -> (i32, i32) {
    %c0_i32 = arith.constant 0 : i32
    %c0_i32_0 = arith.constant 0 : i32
    %c0_i32_1 = arith.constant 0 : i32
    return %c0_i32, %c0_i32_0 : i32, i32
  }
  func.func @transform_4(%arg0: i32, %arg1: i32) -> (i32, i32) {
    %c0_i32 = arith.constant 0 : i32
    %c0_i32_0 = arith.constant 0 : i32
    %c0_i32_1 = arith.constant 0 : i32
    return %c0_i32, %c0_i32_0 : i32, i32
  }
  func.func @transform_5(%arg0: i32, %arg1: i32) -> (i32, i32) {
    %c0_i32 = arith.constant 0 : i32
    return %arg0, %arg1 : i32, i32
  }
}

module attributes {stable_mosaic.version = 11 : i64} {
  func.func @_fused_prenorm_linear_kernel(%arg0: i32, %arg1: i32, %arg2: memref<16x32xf32, #tpu.memory_space<vmem>>, %arg3: memref<1x32xf32, #tpu.memory_space<vmem>>, %arg4: memref<1x32xf32, #tpu.memory_space<vmem>>, %arg5: memref<32x32xf32, #tpu.memory_space<vmem>>, %arg6: memref<1x32xf32, #tpu.memory_space<vmem>>, %arg7: memref<16x32xf32, #tpu.memory_space<vmem>>, %arg8: memref<16x32xf32, #tpu.memory_space<vmem>>) attributes {dimension_semantics = [#tpu.dimension_semantics<parallel>, #tpu.dimension_semantics<arbitrary>], iteration_bounds = array<i64: 1, 1>, scalar_prefetch = 0 : i64, scratch_operands = 1 : i64, tpu.core_type = #tpu.core_type<tc>, window_params = [{transform_indices = @transform_0, window_bounds = array<i64: 16, 32>}, {pipeline_mode = #tpu.pipeline_mode<synchronous>, transform_indices = @transform_1, window_bounds = array<i64: 1, 32>}, {pipeline_mode = #tpu.pipeline_mode<synchronous>, transform_indices = @transform_2, window_bounds = array<i64: 1, 32>}, {pipeline_mode = #tpu.pipeline_mode<synchronous>, transform_indices = @transform_3, window_bounds = array<i64: 32, 32>}, {pipeline_mode = #tpu.pipeline_mode<synchronous>, transform_indices = @transform_4, window_bounds = array<i64: 1, 32>}, {transform_indices = @transform_5, window_bounds = array<i64: 16, 32>}]} {
    %c0_i32 = arith.constant 0 : i32
    %0 = arith.cmpi eq, %arg1, %c0_i32 : i32
    %1 = arith.extui %0 : i1 to i32
    %c0_i32_0 = arith.constant 0 : i32
    %2 = arith.cmpi ne, %1, %c0_i32_0 : i32
    scf.if %2 {
      %c0_8 = arith.constant 0 : index
      %c0_9 = arith.constant 0 : index
      %10 = vector.load %arg2[%c0_8, %c0_9] : memref<16x32xf32, #tpu.memory_space<vmem>>, vector<16x32xf32>
      %c0_10 = arith.constant 0 : index
      %c0_11 = arith.constant 0 : index
      %11 = vector.load %arg3[%c0_10, %c0_11] : memref<1x32xf32, #tpu.memory_space<vmem>>, vector<1x32xf32>
      %c0_12 = arith.constant 0 : index
      %c0_13 = arith.constant 0 : index
      %12 = vector.load %arg4[%c0_12, %c0_13] : memref<1x32xf32, #tpu.memory_space<vmem>>, vector<1x32xf32>
      %cst_14 = arith.constant dense<0.000000e+00> : vector<16xf32>
      %13 = vector.multi_reduction <add>, %10, %cst_14 [1] : vector<16x32xf32> to vector<16xf32>
      %14 = vector.shape_cast %13 : vector<16xf32> to vector<16x1xf32>
      %cst_15 = arith.constant 3.200000e+01 : f32
      %15 = vector.broadcast %cst_15 : f32 to vector<16x1xf32>
      %16 = arith.divf %14, %15 : vector<16x1xf32>
      %17 = vector.broadcast %16 : vector<16x1xf32> to vector<16x32xf32>
      %18 = arith.subf %10, %17 : vector<16x32xf32>
      %19 = arith.mulf %18, %18 : vector<16x32xf32>
      %cst_16 = arith.constant dense<0.000000e+00> : vector<16xf32>
      %20 = vector.multi_reduction <add>, %19, %cst_16 [1] : vector<16x32xf32> to vector<16xf32>
      %21 = vector.shape_cast %20 : vector<16xf32> to vector<16x1xf32>
      %cst_17 = arith.constant 3.200000e+01 : f32
      %22 = vector.broadcast %cst_17 : f32 to vector<16x1xf32>
      %23 = arith.divf %21, %22 : vector<16x1xf32>
      %cst_18 = arith.constant 9.99999974E-6 : f32
      %24 = vector.broadcast %cst_18 : f32 to vector<16x1xf32>
      %25 = arith.addf %23, %24 : vector<16x1xf32>
      %26 = math.rsqrt %25 : vector<16x1xf32>
      %27 = vector.broadcast %26 : vector<16x1xf32> to vector<16x32xf32>
      %28 = arith.mulf %18, %27 : vector<16x32xf32>
      %29 = vector.broadcast %11 : vector<1x32xf32> to vector<16x32xf32>
      %30 = arith.mulf %28, %29 : vector<16x32xf32>
      %31 = vector.broadcast %12 : vector<1x32xf32> to vector<16x32xf32>
      %32 = arith.addf %30, %31 : vector<16x32xf32>
      %c0_19 = arith.constant 0 : index
      %c0_20 = arith.constant 0 : index
      %33 = vector.load %arg8[%c0_19, %c0_20] : memref<16x32xf32, #tpu.memory_space<vmem>>, vector<16x32xf32>
      tpu.vector_store %arg8[%c0_19, %c0_20], %32 {strides = array<i32>} : memref<16x32xf32, #tpu.memory_space<vmem>>, vector<16x32xf32>,
    } else {
    }
    %c0 = arith.constant 0 : index
    %c0_1 = arith.constant 0 : index
    %3 = vector.load %arg8[%c0, %c0_1] : memref<16x32xf32, #tpu.memory_space<vmem>>, vector<16x32xf32>
    %c0_2 = arith.constant 0 : index
    %c0_3 = arith.constant 0 : index
    %4 = vector.load %arg5[%c0_2, %c0_3] : memref<32x32xf32, #tpu.memory_space<vmem>>, vector<32x32xf32>
    %cst = arith.constant dense<0.000000e+00> : vector<16x32xf32>
    %5 = tpu.matmul %3, %4, %cst {dimension_numbers = #tpu.dot_dimension_numbers<[1], [0], [0], [1], [0, 0, 1, 1], [], []>} : vector<16x32xf32>, vector<32x32xf32>, vector<16x32xf32> -> vector<16x32xf32>
    %c0_4 = arith.constant 0 : index
    %c0_5 = arith.constant 0 : index
    %6 = vector.load %arg6[%c0_4, %c0_5] : memref<1x32xf32, #tpu.memory_space<vmem>>, vector<1x32xf32>
    %7 = vector.broadcast %6 : vector<1x32xf32> to vector<16x32xf32>
    %8 = arith.addf %5, %7 : vector<16x32xf32>
    %c0_6 = arith.constant 0 : index
    %c0_7 = arith.constant 0 : index
    %9 = vector.load %arg7[%c0_6, %c0_7] : memref<16x32xf32, #tpu.memory_space<vmem>>, vector<16x32xf32>
    tpu.vector_store %arg7[%c0_6, %c0_7], %8 {strides = array<i32>} : memref<16x32xf32, #tpu.memory_space<vmem>>, vector<16x32xf32>,
    return
  }
  func.func @transform_0(%arg0: i32, %arg1: i32) -> (i32, i32) {
    %c0_i32 = arith.constant 0 : i32
    %c0_i32_0 = arith.constant 0 : i32
    return %arg0, %c0_i32 : i32, i32
  }
  func.func @transform_1(%arg0: i32, %arg1: i32) -> (i32, i32) {
    %c0_i32 = arith.constant 0 : i32
    %c0_i32_0 = arith.constant 0 : i32
    %c0_i32_1 = arith.constant 0 : i32
    return %c0_i32, %c0_i32_0 : i32, i32
  }
  func.func @transform_2(%arg0: i32, %arg1: i32) -> (i32, i32) {
    %c0_i32 = arith.constant 0 : i32
    %c0_i32_0 = arith.constant 0 : i32
    %c0_i32_1 = arith.constant 0 : i32
    return %c0_i32, %c0_i32_0 : i32, i32
  }
  func.func @transform_3(%arg0: i32, %arg1: i32) -> (i32, i32) {
    %c0_i32 = arith.constant 0 : i32
    %c0_i32_0 = arith.constant 0 : i32
    %c0_i32_1 = arith.constant 0 : i32
    return %c0_i32, %c0_i32_0 : i32, i32
  }
  func.func @transform_4(%arg0: i32, %arg1: i32) -> (i32, i32) {
    %c0_i32 = arith.constant 0 : i32
    %c0_i32_0 = arith.constant 0 : i32
    %c0_i32_1 = arith.constant 0 : i32
    return %c0_i32, %c0_i32_0 : i32, i32
  }
  func.func @transform_5(%arg0: i32, %arg1: i32) -> (i32, i32) {
    %c0_i32 = arith.constant 0 : i32
    return %arg0, %arg1 : i32, i32
  }
}

</mosaic_0001>

<bundles_post_ra>
// kernel: tpu_custom_call.1
= control target key start
LH: loop header
LB: loop body
LE: loop exit
PB: predicated region body
PF: predicated region fallthrough
CT: control target
= control target key end

     0   :  { %10 = vsyncpa [#allocation4], 0  ;;  %s387_s0 = inlined_call_operand.hbm [shape: f32[16,32], index: 0, kind: input, shape index: {}]   ;;  %s388_s1 = inlined_call_operand.vmem [shape: f32[1,32], index: 1, kind: input, shape index: {}]   ;;  %s389_s2 = inlined_call_operand.vmem [shape: f32[1,32], index: 2, kind: input, shape index: {}]   ;;  %s390_s3 = inlined_call_operand.hbm [shape: f32[32,32], index: 3, kind: input, shape index: {}]   ;;  %s391_s4 = inlined_call_operand.vmem [shape: f32[1,32], index: 4, kind: input, shape index: {}]   ;;  %s392_s5 = inlined_call_operand.hbm [shape: f32[16,32], index: 5, kind: output, shape index: {}]  }
   0x1   :  { %11 = vsyncpa [#allocation7], 0 }
   0x2   :  { %12 = vsyncpa [#allocation5], 0  ;;  %s315_s18 = smov [#allocation3]  }
   0x3   :  { %s18_s19 = sshll.u32 %s315_s18, 4  ;;  %s19_s19 = int_to_ptr.vmem [resolvable:$true] %s18_s19 }
   0x4   :  { %s257_s20 = scalar_lea.vmem %s19_s19, 256  ;;  %p262_p1 = scmp.lt.s32.totalorder %s19_s19, %s19_s19 }
   0x5   :  { %p258_p0 = scmp.ne.s32.totalorder %s19_s19, %s257_s20  ;;  %p263_p2 = scmp.lt.s32.totalorder %s257_s20, %s257_s20 }
   0x7   :  { %p264_p3 = por %p263_p2, %p262_p1 }
   0x9   :  { %p265_p4 = pnand %p264_p3, %p258_p0 }
   0xb   :  { %268 = shalt.err (!%p265_p4)
}
   0xc   :  { %s316_s21 = smov 128   ;;  %s317_s22 = smov 8  }
   0xd   :  { %24 = dma.hbm_to_vmem [thread:$0]  %s387_s0, 256, %s19_s19, [#allocation4], %s316_s21, %s316_s21, %s317_s22  }
   0xe   :  { %s318_s25 = smov [#allocation6]  }
   0xf   :  { %s34_s26 = sshll.u32 %s318_s25, 4  ;;  %s35_s26 = int_to_ptr.vmem [resolvable:$true] %s34_s26 }
  0x10   :  { %s277_s27 = scalar_lea.vmem %s35_s26, 512  ;;  %p282_p6 = scmp.lt.s32.totalorder %s35_s26, %s35_s26 }
  0x11   :  { %p278_p5 = scmp.ne.s32.totalorder %s35_s26, %s277_s27  ;;  %p283_p7 = scmp.lt.s32.totalorder %s277_s27, %s277_s27 }
  0x13   :  { %p284_p8 = por %p283_p7, %p282_p6 }
  0x15   :  { %p285_p9 = pnand %p284_p8, %p278_p5 }
  0x17   :  { %288 = shalt.err (!%p285_p9)
}
  0x18   :  { %40 = dma.hbm_to_vmem [thread:$0]  %s390_s3, 512, %s35_s26, [#allocation7], %s316_s21, %s316_s21, %s317_s22  }
  0x19   :  { %309 = dma.done.wait [#allocation4], 256  }
  0x1a   :  { %310 = vsyncadd [#allocation4], 4294967040 }
  0x1b   :  { %311 = dma.done.wait [#allocation7], 512  }
  0x1c   :  { %312 = vsyncadd [#allocation7], 4294966784  ;;  %vm57_vm0 = vcmask 261120   ;;  %v53_v0 = vld [vmem:[#allocation3] sm:$0xff]  ;;  %v54_v1 = vld [vmem:[#allocation3 + $0x8] sm:$0xff] }
  0x1d   :  { %v58_v2 = vsel %vm57_vm0, %v53_v0, 0.0  ;;  %v61_v3 = vsel %vm57_vm0, %v54_v1, 0.0  ;;  %v108_v14 = vld [vmem:[#allocation6 + $0x18] sm:$0xff]  ;;  %v107_v15 = vld [vmem:[#allocation6 + $0x10] sm:$0xff]  ;;  %v106_v16 = vld [vmem:[#allocation6 + $0x8] sm:$0xff] }
  0x1e   :  { %59 = vadd.xlane.f32.xlu0 %v58_v2  ;;  %229 = vmatprep.subr.mxu0 %v108_v14  ;;  %v105_v17 = vld [vmem:[#allocation6] sm:$0xff] }
  0x1f   :  { %230 = vmatpush3.msra.mxu0 %v108_v14  ;;  %v218_v25 = vld [vmem:[%s388_s1] ss:$0 sm:$0xff] }
  0x20   :  { %231 = vmatprep.subr.mxu0 %v107_v15  ;;  %v219_v27 = vld [vmem:[%s389_s2] ss:$0 sm:$0xff]  ;;  %s319_s2 = smov [#allocation8]  }
  0x21   :  { %232 = vmatpush3.msra.mxu0 %v107_v15  ;;  %v220_v36 = vld [vmem:[%s391_s4] ss:$0 sm:$0xff]  ;;  %s205_s8 = sshll.u32 %s319_s2, 4  ;;  %s206_s8 = int_to_ptr.vmem [resolvable:$true] %s205_s8 }
  0x22   :  { %62 = vadd.xlane.f32.xlu0 %v61_v3  ;;  %233 = vmatprep.subr.mxu0 %v106_v16  ;;  %s289_s9 = scalar_lea.vmem %s206_s8, 256  ;;  %p294_p11 = scmp.lt.s32.totalorder %s206_s8, %s206_s8 }
  0x23   :  { %234 = vmatpush3.msra.mxu0 %v106_v16  ;;  %p290_p10 = scmp.ne.s32.totalorder %s206_s8, %s289_s9  ;;  %p295_p12 = scmp.lt.s32.totalorder %s289_s9, %s289_s9 }
  0x24   :  { %235 = vmatprep.subr.mxu0 %v105_v17 }
  0x25   :  { %236 = vmatpush3.msra.mxu0 %v105_v17  ;;  %p296_p13 = por %p295_p12, %p294_p11 }
  0x27   :  { %p297_p0 = pnand %p296_p13, %p290_p10 }
  0xa7   :  { %v60_v4 = vpop.xlane.xlu0 %59 }
  0xa8   :  { %v65_v5 = vmul.f32 0.03125, %v60_v4 }
  0xaa   :  { %v67_v6 = vsub.f32 %v53_v0, %v65_v5 }
  0xab   :  { %v63_v7 = vpop.xlane.xlu0 %62 }
  0xac   :  { %v66_v8 = vmul.f32 0.03125, %v63_v7  ;;  %v69_v9 = vmul.f32 %v67_v6, %v67_v6 }
  0xae   :  { %v68_v10 = vsub.f32 %v54_v1, %v66_v8  ;;  %v71_v11 = vsel %vm57_vm0, %v69_v9, 0.0 }
  0xaf   :  { %72 = vadd.xlane.f32.xlu1 %v71_v11 }
  0xb0   :  { %v70_v12 = vmul.f32 %v68_v10, %v68_v10 }
  0xb2   :  { %v74_v13 = vsel %vm57_vm0, %v70_v12, 0.0 }
  0xb3   :  { %75 = vadd.xlane.f32.xlu1 %v74_v13 }
 0x138   :  { %v73_v18 = vpop.xlane.xlu1 %72 }
 0x139   :  { %v77_v19 = vmul.f32 0.03125, %v73_v18 }
 0x13b   :  { %v79_v20 = vadd.f32 1e-05, %v77_v19 }
 0x13c   :  { %v76_v21 = vpop.xlane.xlu1 %75 }
 0x13d   :  { %245 = vrsqrt.f32 %v79_v20  ;;  %v78_v22 = vmul.f32 0.03125, %v76_v21 }
 0x13f   :  { %v80_v23 = vadd.f32 1e-05, %v78_v22 }
 0x141   :  { %247 = vrsqrt.f32 %v80_v23 }
 0x14a   :  { %v246_v24 = vpop.eup %245 }
 0x14b   :  { %v83_v26 = vmul.f32 %v246_v24, %v67_v6 }
 0x14d   :  { %v91_v28 = vmul.f32 %v218_v25, %v83_v26 }
 0x14e   :  { %v248_v29 = vpop.eup %247 }
 0x14f   :  { %v99_v30 = vadd.f32 %v219_v27, %v91_v28  ;;  %v84_v31 = vmul.f32 %v248_v29, %v68_v10 }
 0x151   :  { %101 = vst.msk [vmem:[#allocation2] sm:$0xff] %vm57_vm0, %v99_v30  ;;  %v92_v32 = vmul.f32 %v218_v25, %v84_v31 }
 0x153   :  { %v100_v33 = vadd.f32 %v219_v27, %v92_v32 }
 0x155   :  { %102 = vst.msk [vmem:[#allocation2 + $0x8] sm:$0xff] %vm57_vm0, %v100_v33 }
 0x158   :  { %v103_v34 = vld [vmem:[#allocation2] sm:$0xff] }
 0x159   :  { %237 = vmatprep.mubr.msk.f32.mxu0 %vm57_vm0, %v103_v34 }
 0x15c   :  { %v104_v35 = vld [vmem:[#allocation2 + $0x8] sm:$0xff] }
 0x15d   :  { %238 = vmatmul.mubr.msk.f32.vlgmr.msra.gmra.mxu0 %vm57_vm0, %v104_v35 }
 0x21d   :  { %v239_v37 = vpop.f32.mrf.mxu0 }
 0x21e   :  { %v195_v38 = vadd.f32 %v239_v37, %v220_v36 }
 0x21f   :  { %v189_v39 = vpop.f32.mrf.mxu0 }
 0x220   :  { %199 = vst.msk [vmem:[#allocation8 + $0x8] sm:$0xff] %vm57_vm0, %v195_v38  ;;  %v190_v40 = vadd.f32 %v220_v36, %v189_v39 }
 0x222   :  { %198 = vst.msk [vmem:[#allocation8] sm:$0xff] %vm57_vm0, %v190_v40 }
 0x223   :  { %300 = shalt.err (!%p297_p0)
}
 0x224   :  { %211 = dma.vmem_to_hbm [thread:$0]  %s206_s8, 256, %s392_s5, [#allocation5], %s316_s21, %s316_s21, %s317_s22  }
 0x225   :  { %313 = dma.done.wait [#allocation5], 256  }
 0x226   :  { %314 = vsyncadd [#allocation5], 4294967040 }
 0x227   :  { %215 = vsyncpa [#allocation4], 1 }
 0x228   :  { %216 = vsyncpa [#allocation7], 1 }
 0x229   :  { %217 = vsyncpa [#allocation5], 1 }

// kernel: tpu_custom_call.1
= control target key start
LH: loop header
LB: loop body
LE: loop exit
PB: predicated region body
PF: predicated region fallthrough
CT: control target
= control target key end

     0   :  { %10 = vsyncpa [#allocation4], 0  ;;  %s387_s0 = inlined_call_operand.hbm [shape: f32[16,32], index: 0, kind: input, shape index: {}]   ;;  %s388_s1 = inlined_call_operand.vmem [shape: f32[1,32], index: 1, kind: input, shape index: {}]   ;;  %s389_s2 = inlined_call_operand.vmem [shape: f32[1,32], index: 2, kind: input, shape index: {}]   ;;  %s390_s3 = inlined_call_operand.hbm [shape: f32[32,32], index: 3, kind: input, shape index: {}]   ;;  %s391_s4 = inlined_call_operand.vmem [shape: f32[1,32], index: 4, kind: input, shape index: {}]   ;;  %s392_s5 = inlined_call_operand.hbm [shape: f32[16,32], index: 5, kind: output, shape index: {}]  }
   0x1   :  { %11 = vsyncpa [#allocation7], 0 }
   0x2   :  { %12 = vsyncpa [#allocation5], 0  ;;  %s315_s18 = smov [#allocation3]  }
   0x3   :  { %s18_s19 = sshll.u32 %s315_s18, 4  ;;  %s19_s19 = int_to_ptr.vmem [resolvable:$true] %s18_s19 }
   0x4   :  { %s257_s20 = scalar_lea.vmem %s19_s19, 256  ;;  %p262_p1 = scmp.lt.s32.totalorder %s19_s19, %s19_s19 }
   0x5   :  { %p258_p0 = scmp.ne.s32.totalorder %s19_s19, %s257_s20  ;;  %p263_p2 = scmp.lt.s32.totalorder %s257_s20, %s257_s20 }
   0x7   :  { %p264_p3 = por %p263_p2, %p262_p1 }
   0x9   :  { %p265_p4 = pnand %p264_p3, %p258_p0 }
   0xb   :  { %268 = shalt.err (!%p265_p4)
}
   0xc   :  { %s316_s21 = smov 128   ;;  %s317_s22 = smov 8  }
   0xd   :  { %24 = dma.hbm_to_vmem [thread:$0]  %s387_s0, 256, %s19_s19, [#allocation4], %s316_s21, %s316_s21, %s317_s22  }
   0xe   :  { %s318_s25 = smov [#allocation6]  }
   0xf   :  { %s34_s26 = sshll.u32 %s318_s25, 4  ;;  %s35_s26 = int_to_ptr.vmem [resolvable:$true] %s34_s26 }
  0x10   :  { %s277_s27 = scalar_lea.vmem %s35_s26, 512  ;;  %p282_p6 = scmp.lt.s32.totalorder %s35_s26, %s35_s26 }
  0x11   :  { %p278_p5 = scmp.ne.s32.totalorder %s35_s26, %s277_s27  ;;  %p283_p7 = scmp.lt.s32.totalorder %s277_s27, %s277_s27 }
  0x13   :  { %p284_p8 = por %p283_p7, %p282_p6 }
  0x15   :  { %p285_p9 = pnand %p284_p8, %p278_p5 }
  0x17   :  { %288 = shalt.err (!%p285_p9)
}
  0x18   :  { %40 = dma.hbm_to_vmem [thread:$0]  %s390_s3, 512, %s35_s26, [#allocation7], %s316_s21, %s316_s21, %s317_s22  }
  0x19   :  { %309 = dma.done.wait [#allocation4], 256  }
  0x1a   :  { %310 = vsyncadd [#allocation4], 4294967040 }
  0x1b   :  { %311 = dma.done.wait [#allocation7], 512  }
  0x1c   :  { %312 = vsyncadd [#allocation7], 4294966784  ;;  %vm57_vm0 = vcmask 261120   ;;  %v53_v0 = vld [vmem:[#allocation3] sm:$0xff]  ;;  %v54_v1 = vld [vmem:[#allocation3 + $0x8] sm:$0xff] }
  0x1d   :  { %v58_v2 = vsel %vm57_vm0, %v53_v0, 0.0  ;;  %v61_v3 = vsel %vm57_vm0, %v54_v1, 0.0  ;;  %v108_v14 = vld [vmem:[#allocation6 + $0x18] sm:$0xff]  ;;  %v107_v15 = vld [vmem:[#allocation6 + $0x10] sm:$0xff]  ;;  %v106_v16 = vld [vmem:[#allocation6 + $0x8] sm:$0xff] }
  0x1e   :  { %59 = vadd.xlane.f32.xlu0 %v58_v2  ;;  %229 = vmatprep.subr.mxu0 %v108_v14  ;;  %v105_v17 = vld [vmem:[#allocation6] sm:$0xff] }
  0x1f   :  { %230 = vmatpush3.msra.mxu0 %v108_v14  ;;  %v218_v25 = vld [vmem:[%s388_s1] ss:$0 sm:$0xff] }
  0x20   :  { %231 = vmatprep.subr.mxu0 %v107_v15  ;;  %v219_v27 = vld [vmem:[%s389_s2] ss:$0 sm:$0xff]  ;;  %s319_s2 = smov [#allocation8]  }
  0x21   :  { %232 = vmatpush3.msra.mxu0 %v107_v15  ;;  %v220_v36 = vld [vmem:[%s391_s4] ss:$0 sm:$0xff]  ;;  %s205_s8 = sshll.u32 %s319_s2, 4  ;;  %s206_s8 = int_to_ptr.vmem [resolvable:$true] %s205_s8 }
  0x22   :  { %62 = vadd.xlane.f32.xlu0 %v61_v3  ;;  %233 = vmatprep.subr.mxu0 %v106_v16  ;;  %s289_s9 = scalar_lea.vmem %s206_s8, 256  ;;  %p294_p11 = scmp.lt.s32.totalorder %s206_s8, %s206_s8 }
  0x23   :  { %234 = vmatpush3.msra.mxu0 %v106_v16  ;;  %p290_p10 = scmp.ne.s32.totalorder %s206_s8, %s289_s9  ;;  %p295_p12 = scmp.lt.s32.totalorder %s289_s9, %s289_s9 }
  0x24   :  { %235 = vmatprep.subr.mxu0 %v105_v17 }
  0x25   :  { %236 = vmatpush3.msra.mxu0 %v105_v17  ;;  %p296_p13 = por %p295_p12, %p294_p11 }
  0x27   :  { %p297_p0 = pnand %p296_p13, %p290_p10 }
  0xa7   :  { %v60_v4 = vpop.xlane.xlu0 %59 }
  0xa8   :  { %v65_v5 = vmul.f32 0.03125, %v60_v4 }
  0xaa   :  { %v67_v6 = vsub.f32 %v53_v0, %v65_v5 }
  0xab   :  { %v63_v7 = vpop.xlane.xlu0 %62 }
  0xac   :  { %v66_v8 = vmul.f32 0.03125, %v63_v7  ;;  %v69_v9 = vmul.f32 %v67_v6, %v67_v6 }
  0xae   :  { %v68_v10 = vsub.f32 %v54_v1, %v66_v8  ;;  %v71_v11 = vsel %vm57_vm0, %v69_v9, 0.0 }
  0xaf   :  { %72 = vadd.xlane.f32.xlu1 %v71_v11 }
  0xb0   :  { %v70_v12 = vmul.f32 %v68_v10, %v68_v10 }
  0xb2   :  { %v74_v13 = vsel %vm57_vm0, %v70_v12, 0.0 }
  0xb3   :  { %75 = vadd.xlane.f32.xlu1 %v74_v13 }
 0x138   :  { %v73_v18 = vpop.xlane.xlu1 %72 }
 0x139   :  { %v77_v19 = vmul.f32 0.03125, %v73_v18 }
 0x13b   :  { %v79_v20 = vadd.f32 1e-05, %v77_v19 }
 0x13c   :  { %v76_v21 = vpop.xlane.xlu1 %75 }
 0x13d   :  { %245 = vrsqrt.f32 %v79_v20  ;;  %v78_v22 = vmul.f32 0.03125, %v76_v21 }
 0x13f   :  { %v80_v23 = vadd.f32 1e-05, %v78_v22 }
 0x141   :  { %247 = vrsqrt.f32 %v80_v23 }
 0x14a   :  { %v246_v24 = vpop.eup %245 }
 0x14b   :  { %v83_v26 = vmul.f32 %v246_v24, %v67_v6 }
 0x14d   :  { %v91_v28 = vmul.f32 %v218_v25, %v83_v26 }
 0x14e   :  { %v248_v29 = vpop.eup %247 }
 0x14f   :  { %v99_v30 = vadd.f32 %v219_v27, %v91_v28  ;;  %v84_v31 = vmul.f32 %v248_v29, %v68_v10 }
 0x151   :  { %101 = vst.msk [vmem:[#allocation2] sm:$0xff] %vm57_vm0, %v99_v30  ;;  %v92_v32 = vmul.f32 %v218_v25, %v84_v31 }
 0x153   :  { %v100_v33 = vadd.f32 %v219_v27, %v92_v32 }
 0x155   :  { %102 = vst.msk [vmem:[#allocation2 + $0x8] sm:$0xff] %vm57_vm0, %v100_v33 }
 0x158   :  { %v103_v34 = vld [vmem:[#allocation2] sm:$0xff] }
 0x159   :  { %237 = vmatprep.mubr.msk.f32.mxu0 %vm57_vm0, %v103_v34 }
 0x15c   :  { %v104_v35 = vld [vmem:[#allocation2 + $0x8] sm:$0xff] }
 0x15d   :  { %238 = vmatmul.mubr.msk.f32.vlgmr.msra.gmra.mxu0 %vm57_vm0, %v104_v35 }
 0x21d   :  { %v239_v37 = vpop.f32.mrf.mxu0 }
 0x21e   :  { %v195_v38 = vadd.f32 %v239_v37, %v220_v36 }
 0x21f   :  { %v189_v39 = vpop.f32.mrf.mxu0 }
 0x220   :  { %199 = vst.msk [vmem:[#allocation8 + $0x8] sm:$0xff] %vm57_vm0, %v195_v38  ;;  %v190_v40 = vadd.f32 %v220_v36, %v189_v39 }
 0x222   :  { %198 = vst.msk [vmem:[#allocation8] sm:$0xff] %vm57_vm0, %v190_v40 }
 0x223   :  { %300 = shalt.err (!%p297_p0)
}
 0x224   :  { %211 = dma.vmem_to_hbm [thread:$0]  %s206_s8, 256, %s392_s5, [#allocation5], %s316_s21, %s316_s21, %s317_s22  }
 0x225   :  { %313 = dma.done.wait [#allocation5], 256  }
 0x226   :  { %314 = vsyncadd [#allocation5], 4294967040 }
 0x227   :  { %215 = vsyncpa [#allocation4], 1 }
 0x228   :  { %216 = vsyncpa [#allocation7], 1 }
 0x229   :  { %217 = vsyncpa [#allocation5], 1 }

</bundles_post_ra>
